<compile_context>
chip_gen: v5e
topology: v5e:2x2
jax: 0.10.0
libtpu: 0.0.40
codegen_flags: <defaults>
</compile_context>

<pallas_src>
import math
import functools

import numpy as np
import jax
import jax.numpy as jnp
from jax.experimental import pallas as pl
from jax.experimental.pallas import tpu as pltpu

# ----------------------------- config -----------------------------
D_MODEL = 32
NHEAD = 4
HEAD_DIM = D_MODEL // NHEAD
DIM_FF = 64
SEQ = 8
BATCH = 2
LN_EPS = 1e-5

LANE = 128           # QKV packed width (3*D_MODEL = 96 <= 128) and FFN width pad
PSLAB_ROWS = 16      # coalesced bias / LN-param / head-mask slab rows


def _ln(v, g, b, eps):
    """LayerNorm over the (true-width) last axis."""
    mean = jnp.mean(v, axis=-1, keepdims=True)
    c = v - mean
    var = jnp.mean(c * c, axis=-1, keepdims=True)
    return c * jax.lax.rsqrt(var + eps) * g + b


def decoder_layer_kernel(x_ref, w_in_ref, w_out_ref, p_ref, bias_ref, o_ref,
                         *, nhead, eps):
    """One decoder layer on flattened rows.

    x_ref:     (N, D)          flattened (S*B) rows, true width
    w_in_ref:  (2*D, 128)      rows 0:D  = [Wq.T*scale | Wk.T | Wv.T | 0]
                               rows D:2D = W1.T zero-padded to 128 cols
    w_out_ref: (D+128, D)      rows 0:D  = Wo.T ; rows D: = W2.T zero-padded rows
    p_ref:     (16, 128)       row 0 bqkv(packed,scaled) | 1 bo | 2 b1 | 3 b2
                               4 g1 | 5 be1 | 6 g3 | 7 be3 | 8..8+H head masks
    bias_ref:  (H*N, N)        additive batch mask (0 / -1e30), host constant
    o_ref:     (N, D)
    """
    N, D = x_ref.shape
    H = nhead

    x = x_ref[...]                                   # (N, D)
    W_in = w_in_ref[...]                             # (2D, 128)
    W_out = w_out_ref[...]                           # (D+128, D)
    P = p_ref[...]                                   # (16, 128)

    w_qkv = W_in[0:D, :]                             # (D, 128)
    w_1 = W_in[D:2 * D, :]                           # (D, 128)
    w_o = W_out[0:D, :]                              # (D, D)
    w_2 = W_out[D:, :]                               # (128, D)

    b_qkv = P[0:1, :]                                # (1, 128)
    b_o = P[1:2, 0:D]                                # (1, D)
    b_1 = P[2:3, :]                                  # (1, 128)
    b_2 = P[3:4, 0:D]
    g1 = P[4:5, 0:D]
    be1 = P[5:6, 0:D]
    g3 = P[6:7, 0:D]
    be3 = P[7:8, 0:D]
    head_mask = P[8:8 + H, 0:D].reshape(H, 1, D)     # (H, 1, D)

    # ---- QKV projection: single 128-lane MXU pass (scale folded into Wq/bq) ----
    qkv = jnp.dot(x, w_qkv, preferred_element_type=jnp.float32) + b_qkv  # (N, 128)
    q = qkv[:, 0:D]                                  # already scaled by 1/sqrt(Dh)
    k = qkv[:, D:2 * D]
    v = qkv[:, 2 * D:3 * D]

    # ---- fused multi-head attention ----
    # Head-stacked Q: rows [h*N, (h+1)*N) hold Q with only head h's lanes live,
    # so one contraction over D gives per-head scores without per-head loops.
    q_stacked = (q[None, :, :] * head_mask).reshape(H * N, D)            # (H*N, D)

    scores = jax.lax.dot_general(
        q_stacked, k, dimension_numbers=(((1,), (1,)), ((), ())),
        preferred_element_type=jnp.float32)                              # (H*N, N)
    scores = scores + bias_ref[...]                  # host-built batch mask (vadd)

    m = jnp.max(scores, axis=-1, keepdims=True)
    p = jnp.exp(scores - m)
    denom = jnp.sum(p, axis=-1, keepdims=True)
    p = p * pl.reciprocal(denom, approx=False)       # approx=True trips the 1e-4 check

    ctx = jax.lax.dot_general(
        p, v, dimension_numbers=(((1,), (0,)), ((), ())),
        preferred_element_type=jnp.float32)                              # (H*N, D)
    attn = jnp.sum(ctx.reshape(H, N, D) * head_mask, axis=0)             # (N, D)

    attn = jnp.dot(attn, w_o, preferred_element_type=jnp.float32) + b_o  # (N, D)

    # ---- residual + norm1 (post-norm) ----
    y = _ln(x + attn, g1, be1, eps)

    # ---- feed-forward: linear1 -> relu -> linear2 ----
    h1 = jnp.maximum(
        jnp.dot(y, w_1, preferred_element_type=jnp.float32) + b_1, 0.0)  # (N, 128)
    h2 = jnp.dot(h1, w_2, preferred_element_type=jnp.float32) + b_2      # (N, D)

    # ---- residual + norm3 ----
    z = _ln(y + h2, g3, be3, eps)

    o_ref[...] = z.astype(o_ref.dtype)


# ----------------- host-side (one-time) parameter preparation -----------------
def prepare_params(p):
    """Pre-transpose / pack / pad weights; coalesce small params into slabs."""
    D, F, scale = D_MODEL, DIM_FF, 1.0 / math.sqrt(HEAD_DIM)

    wq, wk, wv = jnp.split(p["wqkv"], 3, axis=0)      # each (D, D)
    bq, bk, bv = jnp.split(p["bqkv"], 3, axis=1)      # each (1, D)

    # packed QKV weight: (D, 128) with Wq.T*scale | Wk.T | Wv.T | zeros
    w_qkv = jnp.zeros((D, LANE), jnp.float32)
    w_qkv = w_qkv.at[:, 0:D].set(wq.T.astype(jnp.float32) * scale)
    w_qkv = w_qkv.at[:, D:2 * D].set(wk.T.astype(jnp.float32))
    w_qkv = w_qkv.at[:, 2 * D:3 * D].set(wv.T.astype(jnp.float32))

    w1_t = jnp.zeros((D, LANE), jnp.float32).at[:, :F].set(p["w1"].T.astype(jnp.float32))
    w_in = jnp.concatenate([w_qkv, w1_t], axis=0)     # (2D, 128)

    wo_t = p["wo"].T.astype(jnp.float32)              # (D, D)
    w2_t = jnp.zeros((LANE, D), jnp.float32).at[:F, :].set(p["w2"].T.astype(jnp.float32))
    w_out = jnp.concatenate([wo_t, w2_t], axis=0)     # (D+128, D)

    # coalesced bias / LN-param / head-mask slab
    pslab = jnp.zeros((PSLAB_ROWS, LANE), jnp.float32)
    pslab = pslab.at[0, 0:D].set(bq[0].astype(jnp.float32) * scale)
    pslab = pslab.at[0, D:2 * D].set(bk[0].astype(jnp.float32))
    pslab = pslab.at[0, 2 * D:3 * D].set(bv[0].astype(jnp.float32))
    pslab = pslab.at[1, :D].set(p["bo"][0].astype(jnp.float32))
    pslab = pslab.at[2, :F].set(p["b1"][0].astype(jnp.float32))
    pslab = pslab.at[3, :D].set(p["b2"][0].astype(jnp.float32))
    pslab = pslab.at[4, :D].set(p["g1"][0].astype(jnp.float32))
    pslab = pslab.at[5, :D].set(p["be1"][0].astype(jnp.float32))
    pslab = pslab.at[6, :D].set(p["g3"][0].astype(jnp.float32))
    pslab = pslab.at[7, :D].set(p["be3"][0].astype(jnp.float32))
    for h in range(NHEAD):
        pslab = pslab.at[8 + h, h * HEAD_DIM:(h + 1) * HEAD_DIM].set(1.0)

    # additive batch-attention bias: flattened row r = s*B + b  ->  batch = r % B
    N = SEQ * BATCH
    qi = np.arange(NHEAD * N) % N
    kj = np.arange(N)
    allowed = (qi[:, None] % BATCH) == (kj[None, :] % BATCH)
    attn_bias = jnp.asarray(np.where(allowed, 0.0, -1e30).astype(np.float32))  # (H*N, N)

    return {"w_in": w_in, "w_out": w_out, "pslab": pslab, "attn_bias": attn_bias}


def transformer_decoder_layer(x_sbd, prep):
    """x_sbd: (S, B, D) like PyTorch (batch_first=False). Returns (S, B, D)."""
    S, B, D = x_sbd.shape
    N = S * B

    # flatten (S, B, D) -> (S*B, D): contiguous reshape, no transpose, no padding
    x_flat = x_sbd.reshape(N, D).astype(jnp.float32)

    kernel = functools.partial(decoder_layer_kernel, nhead=NHEAD, eps=LN_EPS)

    def full(shape):
        return pl.BlockSpec(shape, lambda i, _s=shape: (0,) * len(_s))

    out = pl.pallas_call(
        kernel,
        out_shape=jax.ShapeDtypeStruct((N, D), jnp.float32),
        grid=(1,),
        in_specs=[
            full((N, D)),                 # x
            full((2 * D, LANE)),          # w_in  (packed QKV | W1)
            full((D + LANE, D)),          # w_out (Wo | W2)
            full((PSLAB_ROWS, LANE)),     # coalesced biases / LN params / head masks
            full((NHEAD * N, N)),         # additive batch-attention bias
        ],
        out_specs=full((N, D)),
        compiler_params=pltpu.CompilerParams(
            dimension_semantics=("arbitrary",)),
    )(x_flat, prep["w_in"], prep["w_out"], prep["pslab"], prep["attn_bias"])

    return out.reshape(S, B, D)


# --------------------- pure-JAX reference (sanity check) ---------------------
def reference(x_sbd, p):
    x = jnp.transpose(x_sbd, (1, 0, 2)).astype(jnp.float32)  # (B, S, D)

    def ln(v, g, b):
        m = jnp.mean(v, -1, keepdims=True)
        var = jnp.mean((v - m) ** 2, -1, keepdims=True)
        return (v - m) * jax.lax.rsqrt(var + LN_EPS) * g + b

    qkv = jnp.einsum("bsd,ed->bse", x, p["wqkv"]) + p["bqkv"]
    q, k, v = jnp.split(qkv, 3, axis=-1)
    B, S, D = x.shape
    q = q.reshape(B, S, NHEAD, HEAD_DIM).transpose(0, 2, 1, 3) / math.sqrt(HEAD_DIM)
    k = k.reshape(B, S, NHEAD, HEAD_DIM).transpose(0, 2, 1, 3)
    v = v.reshape(B, S, NHEAD, HEAD_DIM).transpose(0, 2, 1, 3)
    s = jnp.einsum("bhqd,bhkd->bhqk", q, k)
    pattn = jax.nn.softmax(s, axis=-1)
    a = jnp.einsum("bhqk,bhkd->bhqd", pattn, v).transpose(0, 2, 1, 3).reshape(B, S, D)
    a = jnp.einsum("bsd,ed->bse", a, p["wo"]) + p["bo"]
    y = ln(x + a, p["g1"], p["be1"])
    h = jnp.maximum(jnp.einsum("bsd,fd->bsf", y, p["w1"]) + p["b1"], 0.0)
    h = jnp.einsum("bsf,df->bsd", h, p["w2"]) + p["b2"]
    z = ln(y + h, p["g3"], p["be3"])
    return jnp.transpose(z, (1, 0, 2))


if __name__ == "__main__":
    key = jax.random.PRNGKey(0)
    ks = jax.random.split(key, 8)

    def init(k, shape, scale):
        return (jax.random.uniform(k, shape, jnp.float32) * 2.0 - 1.0) * scale

    params = {
        "wqkv": init(ks[0], (3 * D_MODEL, D_MODEL), 1.0 / math.sqrt(D_MODEL)),
        "bqkv": jnp.zeros((1, 3 * D_MODEL), jnp.float32),
        "wo":   init(ks[1], (D_MODEL, D_MODEL), 1.0 / math.sqrt(D_MODEL)),
        "bo":   init(ks[2], (1, D_MODEL), 1.0 / math.sqrt(D_MODEL)),
        "w1":   init(ks[3], (DIM_FF, D_MODEL), 1.0 / math.sqrt(D_MODEL)),
        "b1":   init(ks[4], (1, DIM_FF), 1.0 / math.sqrt(D_MODEL)),
        "w2":   init(ks[5], (D_MODEL, DIM_FF), 1.0 / math.sqrt(DIM_FF)),
        "b2":   init(ks[6], (1, D_MODEL), 1.0 / math.sqrt(DIM_FF)),
        "g1":   jnp.ones((1, D_MODEL), jnp.float32),
        "be1":  jnp.zeros((1, D_MODEL), jnp.float32),
        "g3":   jnp.ones((1, D_MODEL), jnp.float32),
        "be3":  jnp.zeros((1, D_MODEL), jnp.float32),
    }

    x = jax.random.normal(ks[7], (SEQ, BATCH, D_MODEL), jnp.float32)

    prep = prepare_params(params)   # one-time host-side pack / transpose / pad

    out = transformer_decoder_layer(x, prep)
    out = jax.block_until_ready(out)

    ref = jax.block_until_ready(reference(x, params))
    assert out.shape == (SEQ, BATCH, D_MODEL)
    assert jnp.allclose(out, ref, rtol=1e-4, atol=1e-4), "mismatch vs reference"

    print("KERNEL_OK")
</pallas_src>

<mosaic_0001>
module attributes {stable_mosaic.version = 11 : i64} {
  func.func @decoder_layer_kernel(%arg0: i32, %arg1: memref<16x32xf32, #tpu.memory_space<vmem>>, %arg2: memref<64x128xf32, #tpu.memory_space<vmem>>, %arg3: memref<160x32xf32, #tpu.memory_space<vmem>>, %arg4: memref<16x128xf32, #tpu.memory_space<vmem>>, %arg5: memref<64x16xf32, #tpu.memory_space<vmem>>, %arg6: memref<16x32xf32, #tpu.memory_space<vmem>>) attributes {dimension_semantics = [#tpu.dimension_semantics<arbitrary>], iteration_bounds = array<i64: 1>, scalar_prefetch = 0 : i64, scratch_operands = 0 : i64, tpu.core_type = #tpu.core_type<tc>, window_params = [{pipeline_mode = #tpu.pipeline_mode<synchronous>, transform_indices = @transform_0, window_bounds = array<i64: 16, 32>}, {pipeline_mode = #tpu.pipeline_mode<synchronous>, transform_indices = @transform_1, window_bounds = array<i64: 64, 128>}, {pipeline_mode = #tpu.pipeline_mode<synchronous>, transform_indices = @transform_2, window_bounds = array<i64: 160, 32>}, {pipeline_mode = #tpu.pipeline_mode<synchronous>, transform_indices = @transform_3, window_bounds = array<i64: 16, 128>}, {pipeline_mode = #tpu.pipeline_mode<synchronous>, transform_indices = @transform_4, window_bounds = array<i64: 64, 16>}, {pipeline_mode = #tpu.pipeline_mode<synchronous>, transform_indices = @transform_5, window_bounds = array<i64: 16, 32>}]} {
    %c0 = arith.constant 0 : index
    %c0_0 = arith.constant 0 : index
    %0 = vector.load %arg1[%c0, %c0_0] : memref<16x32xf32, #tpu.memory_space<vmem>>, vector<16x32xf32>
    %c0_1 = arith.constant 0 : index
    %c0_2 = arith.constant 0 : index
    %1 = vector.load %arg2[%c0_1, %c0_2] : memref<64x128xf32, #tpu.memory_space<vmem>>, vector<64x128xf32>
    %c0_3 = arith.constant 0 : index
    %c0_4 = arith.constant 0 : index
    %2 = vector.load %arg3[%c0_3, %c0_4] : memref<160x32xf32, #tpu.memory_space<vmem>>, vector<160x32xf32>
    %c0_5 = arith.constant 0 : index
    %c0_6 = arith.constant 0 : index
    %3 = vector.load %arg4[%c0_5, %c0_6] : memref<16x128xf32, #tpu.memory_space<vmem>>, vector<16x128xf32>
    %4 = vector.extract_strided_slice %1 {offsets = [0, 0], sizes = [32, 128], strides = [1, 1]} : vector<64x128xf32> to vector<32x128xf32>
    %5 = vector.extract_strided_slice %1 {offsets = [32, 0], sizes = [32, 128], strides = [1, 1]} : vector<64x128xf32> to vector<32x128xf32>
    %6 = vector.extract_strided_slice %2 {offsets = [0, 0], sizes = [32, 32], strides = [1, 1]} : vector<160x32xf32> to vector<32x32xf32>
    %7 = vector.extract_strided_slice %2 {offsets = [32, 0], sizes = [128, 32], strides = [1, 1]} : vector<160x32xf32> to vector<128x32xf32>
    %8 = vector.extract_strided_slice %3 {offsets = [0, 0], sizes = [1, 128], strides = [1, 1]} : vector<16x128xf32> to vector<1x128xf32>
    %9 = vector.extract_strided_slice %3 {offsets = [1, 0], sizes = [1, 32], strides = [1, 1]} : vector<16x128xf32> to vector<1x32xf32>
    %10 = vector.extract_strided_slice %3 {offsets = [2, 0], sizes = [1, 128], strides = [1, 1]} : vector<16x128xf32> to vector<1x128xf32>
    %11 = vector.extract_strided_slice %3 {offsets = [3, 0], sizes = [1, 32], strides = [1, 1]} : vector<16x128xf32> to vector<1x32xf32>
    %12 = vector.extract_strided_slice %3 {offsets = [4, 0], sizes = [1, 32], strides = [1, 1]} : vector<16x128xf32> to vector<1x32xf32>
    %13 = vector.extract_strided_slice %3 {offsets = [5, 0], sizes = [1, 32], strides = [1, 1]} : vector<16x128xf32> to vector<1x32xf32>
    %14 = vector.extract_strided_slice %3 {offsets = [6, 0], sizes = [1, 32], strides = [1, 1]} : vector<16x128xf32> to vector<1x32xf32>
    %15 = vector.extract_strided_slice %3 {offsets = [7, 0], sizes = [1, 32], strides = [1, 1]} : vector<16x128xf32> to vector<1x32xf32>
    %16 = vector.extract_strided_slice %3 {offsets = [8, 0], sizes = [4, 32], strides = [1, 1]} : vector<16x128xf32> to vector<4x32xf32>
    %17 = vector.shape_cast %16 : vector<4x32xf32> to vector<4x1x32xf32>
    %cst = arith.constant dense<0.000000e+00> : vector<16x128xf32>
    %18 = tpu.matmul %0, %4, %cst {dimension_numbers = #tpu.dot_dimension_numbers<[1], [0], [0], [1], [0, 0, 1, 1], [], []>} : vector<16x32xf32>, vector<32x128xf32>, vector<16x128xf32> -> vector<16x128xf32>
    %19 = vector.broadcast %8 : vector<1x128xf32> to vector<16x128xf32>
    %20 = arith.addf %18, %19 : vector<16x128xf32>
    %21 = vector.extract_strided_slice %20 {offsets = [0, 0], sizes = [16, 32], strides = [1, 1]} : vector<16x128xf32> to vector<16x32xf32>
    %22 = vector.extract_strided_slice %20 {offsets = [0, 32], sizes = [16, 32], strides = [1, 1]} : vector<16x128xf32> to vector<16x32xf32>
    %23 = vector.extract_strided_slice %20 {offsets = [0, 64], sizes = [16, 32], strides = [1, 1]} : vector<16x128xf32> to vector<16x32xf32>
    %24 = vector.shape_cast %21 : vector<16x32xf32> to vector<1x16x32xf32>
    %25 = vector.broadcast %24 : vector<1x16x32xf32> to vector<4x16x32xf32>
    %26 = vector.broadcast %17 : vector<4x1x32xf32> to vector<4x16x32xf32>
    %27 = arith.mulf %25, %26 : vector<4x16x32xf32>
    %28 = vector.shape_cast %27 : vector<4x16x32xf32> to vector<64x32xf32>
    %cst_7 = arith.constant dense<0.000000e+00> : vector<64x16xf32>
    %29 = tpu.matmul %28, %22, %cst_7 {dimension_numbers = #tpu.dot_dimension_numbers<[1], [1], [0], [0], [0, 0, 1, 0], [], []>} : vector<64x32xf32>, vector<16x32xf32>, vector<64x16xf32> -> vector<64x16xf32>
    %c0_8 = arith.constant 0 : index
    %c0_9 = arith.constant 0 : index
    %30 = vector.load %arg5[%c0_8, %c0_9] : memref<64x16xf32, #tpu.memory_space<vmem>>, vector<64x16xf32>
    %31 = arith.addf %29, %30 : vector<64x16xf32>
    %cst_10 = arith.constant dense<0xFF800000> : vector<64xf32>
    %32 = vector.multi_reduction <maximumf>, %31, %cst_10 [1] : vector<64x16xf32> to vector<64xf32>
    %33 = vector.shape_cast %32 : vector<64xf32> to vector<64x1xf32>
    %34 = vector.broadcast %33 : vector<64x1xf32> to vector<64x16xf32>
    %35 = arith.subf %31, %34 : vector<64x16xf32>
    %36 = math.exp %35 : vector<64x16xf32>
    %cst_11 = arith.constant dense<0.000000e+00> : vector<64xf32>
    %37 = vector.multi_reduction <add>, %36, %cst_11 [1] : vector<64x16xf32> to vector<64xf32>
    %38 = vector.shape_cast %37 : vector<64xf32> to vector<64x1xf32>
    %39 = tpu.reciprocal %38 : vector<64x1xf32> -> vector<64x1xf32>
    %40 = vector.broadcast %39 : vector<64x1xf32> to vector<64x16xf32>
    %41 = arith.mulf %36, %40 : vector<64x16xf32>
    %cst_12 = arith.constant dense<0.000000e+00> : vector<64x32xf32>
    %42 = tpu.matmul %41, %23, %cst_12 {dimension_numbers = #tpu.dot_dimension_numbers<[1], [0], [0], [1], [0, 0, 1, 1], [], []>} : vector<64x16xf32>, vector<16x32xf32>, vector<64x32xf32> -> vector<64x32xf32>
    %43 = vector.shape_cast %42 : vector<64x32xf32> to vector<4x16x32xf32>
    %44 = vector.broadcast %17 : vector<4x1x32xf32> to vector<4x16x32xf32>
    %45 = arith.mulf %43, %44 : vector<4x16x32xf32>
    %cst_13 = arith.constant dense<0.000000e+00> : vector<16x32xf32>
    %46 = vector.multi_reduction <add>, %45, %cst_13 [0] : vector<4x16x32xf32> to vector<16x32xf32>
    %cst_14 = arith.constant dense<0.000000e+00> : vector<16x32xf32>
    %47 = tpu.matmul %46, %6, %cst_14 {dimension_numbers = #tpu.dot_dimension_numbers<[1], [0], [0], [1], [0, 0, 1, 1], [], []>} : vector<16x32xf32>, vector<32x32xf32>, vector<16x32xf32> -> vector<16x32xf32>
    %48 = vector.broadcast %9 : vector<1x32xf32> to vector<16x32xf32>
    %49 = arith.addf %47, %48 : vector<16x32xf32>
    %50 = arith.addf %0, %49 : vector<16x32xf32>
    %cst_15 = arith.constant dense<0.000000e+00> : vector<16xf32>
    %51 = vector.multi_reduction <add>, %50, %cst_15 [1] : vector<16x32xf32> to vector<16xf32>
    %52 = vector.shape_cast %51 : vector<16xf32> to vector<16x1xf32>
    %cst_16 = arith.constant 3.200000e+01 : f32
    %53 = vector.broadcast %cst_16 : f32 to vector<16x1xf32>
    %54 = arith.divf %52, %53 : vector<16x1xf32>
    %55 = vector.broadcast %54 : vector<16x1xf32> to vector<16x32xf32>
    %56 = arith.subf %50, %55 : vector<16x32xf32>
    %57 = arith.mulf %56, %56 : vector<16x32xf32>
    %cst_17 = arith.constant dense<0.000000e+00> : vector<16xf32>
    %58 = vector.multi_reduction <add>, %57, %cst_17 [1] : vector<16x32xf32> to vector<16xf32>
    %59 = vector.shape_cast %58 : vector<16xf32> to vector<16x1xf32>
    %cst_18 = arith.constant 3.200000e+01 : f32
    %60 = vector.broadcast %cst_18 : f32 to vector<16x1xf32>
    %61 = arith.divf %59, %60 : vector<16x1xf32>
    %cst_19 = arith.constant 9.99999974E-6 : f32
    %62 = vector.broadcast %cst_19 : f32 to vector<16x1xf32>
    %63 = arith.addf %61, %62 : vector<16x1xf32>
    %64 = math.rsqrt %63 : vector<16x1xf32>
    %65 = vector.broadcast %64 : vector<16x1xf32> to vector<16x32xf32>
    %66 = arith.mulf %56, %65 : vector<16x32xf32>
    %67 = vector.broadcast %12 : vector<1x32xf32> to vector<16x32xf32>
    %68 = arith.mulf %66, %67 : vector<16x32xf32>
    %69 = vector.broadcast %13 : vector<1x32xf32> to vector<16x32xf32>
    %70 = arith.addf %68, %69 : vector<16x32xf32>
    %cst_20 = arith.constant dense<0.000000e+00> : vector<16x128xf32>
    %71 = tpu.matmul %70, %5, %cst_20 {dimension_numbers = #tpu.dot_dimension_numbers<[1], [0], [0], [1], [0, 0, 1, 1], [], []>} : vector<16x32xf32>, vector<32x128xf32>, vector<16x128xf32> -> vector<16x128xf32>
    %72 = vector.broadcast %10 : vector<1x128xf32> to vector<16x128xf32>
    %73 = arith.addf %71, %72 : vector<16x128xf32>
    %cst_21 = arith.constant 0.000000e+00 : f32
    %74 = vector.broadcast %cst_21 : f32 to vector<16x128xf32>
    %75 = arith.maximumf %73, %74 : vector<16x128xf32>
    %cst_22 = arith.constant dense<0.000000e+00> : vector<16x32xf32>
    %76 = tpu.matmul %75, %7, %cst_22 {dimension_numbers = #tpu.dot_dimension_numbers<[1], [0], [0], [1], [0, 0, 1, 1], [], []>} : vector<16x128xf32>, vector<128x32xf32>, vector<16x32xf32> -> vector<16x32xf32>
    %77 = vector.broadcast %11 : vector<1x32xf32> to vector<16x32xf32>
    %78 = arith.addf %76, %77 : vector<16x32xf32>
    %79 = arith.addf %70, %78 : vector<16x32xf32>
    %cst_23 = arith.constant dense<0.000000e+00> : vector<16xf32>
    %80 = vector.multi_reduction <add>, %79, %cst_23 [1] : vector<16x32xf32> to vector<16xf32>
    %81 = vector.shape_cast %80 : vector<16xf32> to vector<16x1xf32>
    %cst_24 = arith.constant 3.200000e+01 : f32
    %82 = vector.broadcast %cst_24 : f32 to vector<16x1xf32>
    %83 = arith.divf %81, %82 : vector<16x1xf32>
    %84 = vector.broadcast %83 : vector<16x1xf32> to vector<16x32xf32>
    %85 = arith.subf %79, %84 : vector<16x32xf32>
    %86 = arith.mulf %85, %85 : vector<16x32xf32>
    %cst_25 = arith.constant dense<0.000000e+00> : vector<16xf32>
    %87 = vector.multi_reduction <add>, %86, %cst_25 [1] : vector<16x32xf32> to vector<16xf32>
    %88 = vector.shape_cast %87 : vector<16xf32> to vector<16x1xf32>
    %cst_26 = arith.constant 3.200000e+01 : f32
    %89 = vector.broadcast %cst_26 : f32 to vector<16x1xf32>
    %90 = arith.divf %88, %89 : vector<16x1xf32>
    %cst_27 = arith.constant 9.99999974E-6 : f32
    %91 = vector.broadcast %cst_27 : f32 to vector<16x1xf32>
    %92 = arith.addf %90, %91 : vector<16x1xf32>
    %93 = math.rsqrt %92 : vector<16x1xf32>
    %94 = vector.broadcast %93 : vector<16x1xf32> to vector<16x32xf32>
    %95 = arith.mulf %85, %94 : vector<16x32xf32>
    %96 = vector.broadcast %14 : vector<1x32xf32> to vector<16x32xf32>
    %97 = arith.mulf %95, %96 : vector<16x32xf32>
    %98 = vector.broadcast %15 : vector<1x32xf32> to vector<16x32xf32>
    %99 = arith.addf %97, %98 : vector<16x32xf32>
    %c0_28 = arith.constant 0 : index
    %c0_29 = arith.constant 0 : index
    %100 = vector.load %arg6[%c0_28, %c0_29] : memref<16x32xf32, #tpu.memory_space<vmem>>, vector<16x32xf32>
    tpu.vector_store %arg6[%c0_28, %c0_29], %99 {strides = array<i32>} : memref<16x32xf32, #tpu.memory_space<vmem>>, vector<16x32xf32>,
    return
  }
  func.func @transform_0(%arg0: i32) -> (i32, i32) {
    %c0_i32 = arith.constant 0 : i32
    %c0_i32_0 = arith.constant 0 : i32
    %c0_i32_1 = arith.constant 0 : i32
    return %c0_i32, %c0_i32_0 : i32, i32
  }
  func.func @transform_1(%arg0: i32) -> (i32, i32) {
    %c0_i32 = arith.constant 0 : i32
    %c0_i32_0 = arith.constant 0 : i32
    %c0_i32_1 = arith.constant 0 : i32
    return %c0_i32, %c0_i32_0 : i32, i32
  }
  func.func @transform_2(%arg0: i32) -> (i32, i32) {
    %c0_i32 = arith.constant 0 : i32
    %c0_i32_0 = arith.constant 0 : i32
    %c0_i32_1 = arith.constant 0 : i32
    return %c0_i32, %c0_i32_0 : i32, i32
  }
  func.func @transform_3(%arg0: i32) -> (i32, i32) {
    %c0_i32 = arith.constant 0 : i32
    %c0_i32_0 = arith.constant 0 : i32
    %c0_i32_1 = arith.constant 0 : i32
    return %c0_i32, %c0_i32_0 : i32, i32
  }
  func.func @transform_4(%arg0: i32) -> (i32, i32) {
    %c0_i32 = arith.constant 0 : i32
    %c0_i32_0 = arith.constant 0 : i32
    %c0_i32_1 = arith.constant 0 : i32
    return %c0_i32, %c0_i32_0 : i32, i32
  }
  func.func @transform_5(%arg0: i32) -> (i32, i32) {
    %c0_i32 = arith.constant 0 : i32
    %c0_i32_0 = arith.constant 0 : i32
    %c0_i32_1 = arith.constant 0 : i32
    return %c0_i32, %c0_i32_0 : i32, i32
  }
}

</mosaic_0001>

<bundles_post_ra>
// kernel: tpu_custom_call.1
= control target key start
LH: loop header
LB: loop body
LE: loop exit
PB: predicated region body
PF: predicated region fallthrough
CT: control target
= control target key end

     0   :  { %s1173_s0 = inlined_call_operand.vmem [shape: f32[16,32], index: 0, kind: input, shape index: {}]   ;;  %s1174_s1 = inlined_call_operand.vmem [shape: f32[64,128], index: 1, kind: input, shape index: {}]   ;;  %s1175_s2 = inlined_call_operand.vmem [shape: f32[160,32], index: 2, kind: input, shape index: {}]   ;;  %s1176_s3 = inlined_call_operand.vmem [shape: f32[16,128], index: 3, kind: input, shape index: {}]   ;;  %s1177_s4 = inlined_call_operand.vmem [shape: f32[64,16], index: 4, kind: input, shape index: {}]   ;;  %s1178_s5 = inlined_call_operand.hbm [shape: f32[16,32], index: 5, kind: output, shape index: {}]  }
   0x1   :  { %v26_v0 = vld [vmem:[%s1174_s1 + $0x18] sm:$0xff]  ;;  %v25_v1 = vld [vmem:[%s1174_s1 + $0x10] sm:$0xff]  ;;  %v24_v2 = vld [vmem:[%s1174_s1 + $0x8] sm:$0xff] }
   0x2   :  { %77 = vmatpush.msra.mxu0 %v26_v0 }
   0x3   :  { %10 = vsyncpa [#allocation3], 0  ;;  %v23_v3 = vld [vmem:[%s1174_s1] sm:$0xff]  ;;  %vm58_vm0 = vcmask 261120   ;;  %v855_v5 = vld [vmem:[%s1173_s0 + $0x8] sm:$0xff]  ;;  %s797_s7 = smov 96  }
   0x4   :  { %78 = vmatpush.msra.mxu0 %v25_v1  ;;  %v848_v4 = vld [vmem:[%s1173_s0] sm:$0xff]  ;;  %v52_v14 = vld [vmem:[%s1176_s3 + $0x8] sm:$0xff]  ;;  %vm187_vm1 = vcmask 130048   ;;  %v106_v35 = vld [vmem:[%s1177_s4 + $0x10] sm:$0xff]  ;;  %s801_s19 = smov 128   ;;  %s802_s20 = smov 8  }
   0x5   :  { %v862_v7 = vld [vmem:[%s1176_s3] sm:$0xff]  ;;  %v878_v15 = vperm.slane %v52_v14, 0  ;;  %v54_v19 = vrot.slane %v52_v14, 1  ;;  %v55_v23 = vrot.slane %v52_v14, 2  ;;  %v56_v27 = vrot.slane %v52_v14, 3  ;;  %v105_v31 = vld [vmem:[%s1177_s4 + $0x8] sm:$0xff] }
   0x6   :  { %79 = vmatpush.msra.mxu0 %v24_v2  ;;  %v57_v8 = vperm.slane %v862_v7, 0  ;;  %v107_v39 = vld [vmem:[%s1177_s4 + $0x18] sm:$0xff]  ;;  %v108_v43 = vld [vmem:[%s1177_s4 + $0x20] sm:$0xff]  ;;  %v109_v49 = vld [vmem:[%s1177_s4 + $0x28] sm:$0xff] }
   0x7   :  { %v888_v20 = vperm.slane %v54_v19, 0  ;;  %v896_v24 = vperm.slane %v55_v23, 0  ;;  %v904_v28 = vperm.slane %v56_v27, 0  ;;  %v104_v47 = vld [vmem:[%s1177_s4] sm:$0xff]  ;;  %v110_v55 = vld [vmem:[%s1177_s4 + $0x30] sm:$0xff]  ;;  %v111_v59 = vld [vmem:[%s1177_s4 + $0x38] sm:$0xff] }
   0x8   :  { %80 = vmatpush.msra.mxu0 %v23_v3  ;;  %s798_s4 = smov 64  }
   0x9   :  { %690 = vmatmul.msk.f32.vlgmr.msra.gmra.mxu0 %vm58_vm0, %v848_v4 }
  0x11   :  { %691 = vmatmul.msk.f32.gmra.mxu0 %vm58_vm0, %v855_v5 }
  0x86   :  { %v82_v6 = vpop.f32.mrf.mxu0 }
  0x87   :  { %v867_v11 = vadd.f32 %v82_v6, %v57_v8 }
  0x89   :  { %v96_v17 = vmul.f32 %v878_v15, %v867_v11  ;;  %v98_v21 = vmul.f32 %v888_v20, %v867_v11  ;;  %v100_v25 = vmul.f32 %v896_v24, %v867_v11  ;;  %v102_v29 = vmul.f32 %v904_v28, %v867_v11 }
  0x8e   :  { %v85_v9 = vpop.f32.mrf.mxu0 }
  0x8f   :  { %v865_v10 = vadd.f32 %v85_v9, %v57_v8 }
  0x91   :  { %116 = vrot.lane.b32.xlu0 %v865_v10, %s797_s7  ;;  %v724_v12 = vpack.i.bf16 %v867_v11, %v865_v10  ;;  %v97_v18 = vmul.f32 %v878_v15, %v865_v10  ;;  %v99_v22 = vmul.f32 %v888_v20, %v865_v10  ;;  %v101_v26 = vmul.f32 %v896_v24, %v865_v10 }
  0x92   :  { %v103_v30 = vmul.f32 %v904_v28, %v865_v10 }
  0x99   :  { %114 = vrot.lane.b32.xlu0 %v867_v11, %s797_s7 }
 0x103   :  { %v117_v13 = vpop.permute.xlu0 %116 }
 0x104   :  { %692 = vmatpush.xpose.msk.msrb.mxu0 %vm58_vm0, %v117_v13  ;;  %714 = vmatpush.xpose.msk.msra.mxu1 %vm58_vm0, %v117_v13 }
 0x10b   :  { %v115_v16 = vpop.permute.xlu0 %114 }
 0x10c   :  { %693 = vmatpush.xpose.msk.msrb.mxu0 %vm58_vm0, %v115_v16  ;;  %715 = vmatpush.xpose.msk.msra.mxu1 %vm58_vm0, %v115_v16 }
 0x10f   :  { %694 = vmatmul.msk.f32.vlgmr.msrb.gmra.mxu0 %vm58_vm0, %v96_v17  ;;  %695 = vmatmul.msk.f32.vlgmr.msra.gmra.mxu1 %vm58_vm0, %v97_v18 }
 0x117   :  { %696 = vmatmul.msk.f32.gmra.mxu1 %vm58_vm0, %v98_v21 }
 0x11f   :  { %697 = vmatmul.msk.f32.gmra.mxu1 %vm58_vm0, %v99_v22 }
 0x127   :  { %698 = vmatmul.msk.f32.gmra.mxu1 %vm58_vm0, %v100_v25 }
 0x12f   :  { %699 = vmatmul.msk.f32.gmra.mxu1 %vm58_vm0, %v101_v26 }
 0x137   :  { %700 = vmatmul.msk.f32.gmra.mxu1 %vm58_vm0, %v102_v29 }
 0x13f   :  { %701 = vmatmul.msk.f32.gmra.mxu1 %vm58_vm0, %v103_v30 }
 0x18c   :  { %v166_v32 = vpop.f32.mrf.mxu1  ;;  %v163_v48 = vpop.f32.mrf.mxu0 }
 0x18d   :  { %v167_v33 = vadd.f32 %v166_v32, %v105_v31  ;;  %v164_v50 = vadd.f32 %v163_v48, %v104_v47 }
 0x18f   :  { %v191_v34 = vsel %vm187_vm1, %v167_v33, -inf  ;;  %v188_v54 = vsel %vm187_vm1, %v164_v50, -inf }
 0x190   :  { %192 = vmax.xlane.f32.xlu1 %v191_v34 }
 0x194   :  { %v169_v36 = vpop.f32.mrf.mxu1 }
 0x195   :  { %v170_v37 = vadd.f32 %v169_v36, %v106_v35 }
 0x197   :  { %v194_v38 = vsel %vm187_vm1, %v170_v37, -inf }
 0x198   :  { %195 = vmax.xlane.f32.xlu1 %v194_v38 }
 0x19c   :  { %v172_v40 = vpop.f32.mrf.mxu1 }
 0x19d   :  { %v173_v41 = vadd.f32 %v172_v40, %v107_v39 }
 0x19f   :  { %v197_v42 = vsel %vm187_vm1, %v173_v41, -inf }
 0x1a0   :  { %198 = vmax.xlane.f32.xlu2 %v197_v42 }
 0x1a4   :  { %v175_v44 = vpop.f32.mrf.mxu1 }
 0x1a5   :  { %v176_v45 = vadd.f32 %v175_v44, %v108_v43 }
 0x1a7   :  { %v200_v46 = vsel %vm187_vm1, %v176_v45, -inf }
 0x1a8   :  { %201 = vmax.xlane.f32.xlu2 %v200_v46 }
 0x1ac   :  { %v178_v51 = vpop.f32.mrf.mxu1 }
 0x1ad   :  { %v179_v52 = vadd.f32 %v178_v51, %v109_v49 }
 0x1af   :  { %v203_v53 = vsel %vm187_vm1, %v179_v52, -inf }
 0x1b0   :  { %204 = vmax.xlane.f32.xlu0 %v203_v53  ;;  %189 = vmax.xlane.f32.xlu2 %v188_v54 }
 0x1b4   :  { %v181_v56 = vpop.f32.mrf.mxu1 }
 0x1b5   :  { %v182_v57 = vadd.f32 %v181_v56, %v110_v55 }
 0x1b7   :  { %v206_v58 = vsel %vm187_vm1, %v182_v57, -inf }
 0x1b8   :  { %207 = vmax.xlane.f32.xlu1 %v206_v58 }
 0x1bc   :  { %v184_v60 = vpop.f32.mrf.mxu1 }
 0x1bd   :  { %v185_v61 = vadd.f32 %v184_v60, %v111_v59 }
 0x1bf   :  { %v209_v62 = vsel %vm187_vm1, %v185_v61, -inf }
 0x1c0   :  { %210 = vmax.xlane.f32.xlu1 %v209_v62 }
 0x203   :  { %v193_v63 = vpop.xlane.xlu1 %192 }
 0x204   :  { %v213_v0 = vsub.f32 %v167_v33, %v193_v63 }
 0x206   :  { %v222_v1 = vmul.f32 1.442695, %v213_v0 }
 0x208   :  { %729 = vpow2.f32 %v222_v1 }
 0x20b   :  { %v196_v2 = vpop.xlane.xlu1 %195 }
 0x20c   :  { %v214_v3 = vsub.f32 %v170_v37, %v196_v2 }
 0x20e   :  { %v944_v6 = vpop.eup %729  ;;  %v224_v8 = vmul.f32 1.442695, %v214_v3 }
 0x20f   :  { %v239_v9 = vsel %vm187_vm1, %v944_v6, 0.0 }
 0x210   :  { %731 = vpow2.f32 %v224_v8  ;;  %240 = vadd.xlane.f32.xlu2 %v239_v9 }
 0x213   :  { %v199_v13 = vpop.xlane.xlu2 %198 }
 0x214   :  { %v215_v14 = vsub.f32 %v173_v41, %v199_v13 }
 0x216   :  { %v948_v16 = vpop.eup %731  ;;  %v226_v17 = vmul.f32 1.442695, %v215_v14 }
 0x217   :  { %v242_v18 = vsel %vm187_vm1, %v948_v16, 0.0 }
 0x218   :  { %733 = vpow2.f32 %v226_v17  ;;  %243 = vadd.xlane.f32.xlu1 %v242_v18 }
 0x21b   :  { %v202_v19 = vpop.xlane.xlu2 %201 }
 0x21c   :  { %v216_v21 = vsub.f32 %v176_v45, %v202_v19 }
 0x21e   :  { %v952_v22 = vpop.eup %733  ;;  %v228_v23 = vmul.f32 1.442695, %v216_v21 }
 0x21f   :  { %v245_v25 = vsel %vm187_vm1, %v952_v22, 0.0 }
 0x220   :  { %735 = vpow2.f32 %v228_v23  ;;  %246 = vadd.xlane.f32.xlu2 %v245_v25 }
 0x223   :  { %v205_v26 = vpop.xlane.xlu0 %204  ;;  %v190_v27 = vpop.xlane.xlu2 %189 }
 0x224   :  { %v217_v29 = vsub.f32 %v179_v52, %v205_v26  ;;  %v212_v30 = vsub.f32 %v164_v50, %v190_v27 }
 0x226   :  { %v956_v31 = vpop.eup %735  ;;  %v230_v32 = vmul.f32 1.442695, %v217_v29  ;;  %v220_v33 = vmul.f32 1.442695, %v212_v30 }
 0x227   :  { %v248_v34 = vsel %vm187_vm1, %v956_v31, 0.0 }
 0x228   :  { %737 = vpow2.f32 %v230_v32  ;;  %249 = vadd.xlane.f32.xlu2 %v248_v34 }
 0x229   :  { %739 = vpow2.f32 %v220_v33 }
 0x22b   :  { %v208_v35 = vpop.xlane.xlu1 %207 }
 0x22c   :  { %v218_v36 = vsub.f32 %v182_v57, %v208_v35 }
 0x22e   :  { %v960_v37 = vpop.eup %737  ;;  %v232_v38 = vmul.f32 1.442695, %v218_v36 }
 0x22f   :  { %v962_v39 = vpop.eup %739  ;;  %v251_v40 = vsel %vm187_vm1, %v960_v37, 0.0 }
 0x230   :  { %741 = vpow2.f32 %v232_v38  ;;  %252 = vadd.xlane.f32.xlu2 %v251_v40  ;;  %v236_v41 = vsel %vm187_vm1, %v962_v39, 0.0 }
 0x231   :  { %237 = vadd.xlane.f32.xlu0 %v236_v41  ;;  %725 = vrot.lane.b32.xlu1 %v724_v12, %s798_s4 }
 0x233   :  { %v211_v42 = vpop.xlane.xlu1 %210 }
 0x234   :  { %v219_v43 = vsub.f32 %v185_v61, %v211_v42 }
 0x236   :  { %v971_v44 = vpop.eup %741  ;;  %v234_v45 = vmul.f32 1.442695, %v219_v43 }
 0x237   :  { %v254_v46 = vsel %vm187_vm1, %v971_v44, 0.0 }
 0x238   :  { %743 = vpow2.f32 %v234_v45  ;;  %255 = vadd.xlane.f32.xlu2 %v254_v46 }
 0x23e   :  { %v975_v47 = vpop.eup %743 }
 0x23f   :  { %v257_v48 = vsel %vm187_vm1, %v975_v47, 0.0 }
 0x240   :  { %258 = vadd.xlane.f32.xlu2 %v257_v48 }
 0x283   :  { %v241_v49 = vpop.xlane.xlu2 %240 }
 0x284   :  { %745 = vrcp.f32 %v241_v49  ;;  %v285_v59 = vand.u32 2147483648, %v241_v49  ;;  %vm279_vm3 = vweird.f32 %v241_v49  ;;  %v283_v60 = vand.u32 2147483647, %v241_v49 }
 0x286   :  { %v286_v0 = vor.u32 1.1754944e-38, %v285_v59  ;;  %vm284_vm5 = vcmp.eq.f32.partialorder %v283_v60, 8.507059e+37 }
 0x28a   :  { %v746_v11 = vpop.eup %745 }
 0x28b   :  { %v244_v10 = vpop.xlane.xlu1 %243  ;;  %v275_v12 = vmul.f32 %v746_v11, %v241_v49  ;;  %vm280_vm2 = vweird.f32 %v746_v11 }
 0x28c   :  { %747 = vrcp.f32 %v244_v10  ;;  %vm281_vm4 = vmor %vm279_vm3, %vm280_vm2  ;;  %v299_v18 = vand.u32 2147483648, %v244_v10  ;;  %vm293_vm7 = vweird.f32 %v244_v10  ;;  %v297_v23 = vand.u32 2147483647, %v244_v10 }
 0x28d   :  { %v276_v51 = vsub.f32 1.0, %v275_v12 }
 0x28e   :  { %v300_v29 = vor.u32 1.1754944e-38, %v299_v18  ;;  %vm298_vm9 = vcmp.eq.f32.partialorder %v297_v23, 8.507059e+37 }
 0x28f   :  { %v277_v53 = vmul.f32 %v746_v11, %v276_v51 }
 0x291   :  { %v278_v57 = vadd.f32 %v746_v11, %v277_v53 }
 0x292   :  { %v748_v52 = vpop.eup %747 }
 0x293   :  { %v979_v50 = vpop.xlane.xlu2 %246  ;;  %v289_v54 = vmul.f32 %v748_v52, %v244_v10  ;;  %v282_v63 = vsel %vm281_vm4, %v746_v11, %v278_v57  ;;  %vm294_vm6 = vweird.f32 %v748_v52 }
 0x294   :  { %749 = vrcp.f32 %v979_v50  ;;  %v287_v9 = vsel %vm284_vm5, %v286_v0, %v282_v63  ;;  %vm295_vm8 = vmor %vm293_vm7, %vm294_vm6  ;;  %v313_v38 = vand.u32 2147483648, %v979_v50  ;;  %vm307_vm11 = vweird.f32 %v979_v50 }
 0x295   :  { %v290_v56 = vsub.f32 1.0, %v289_v54  ;;  %v373_v21 = vmul.f32 %v944_v6, %v287_v9  ;;  %v311_v43 = vand.u32 2147483647, %v979_v50 }
 0x296   :  { %v314_v11 = vor.u32 1.1754944e-38, %v313_v38 }
 0x297   :  { %v291_v61 = vmul.f32 %v748_v52, %v290_v56  ;;  %vm312_vm2 = vcmp.eq.f32.partialorder %v311_v43, 8.507059e+37 }
 0x299   :  { %v292_v14 = vadd.f32 %v748_v52, %v291_v61 }
 0x29a   :  { %v984_v58 = vpop.eup %749 }
 0x29b   :  { %v982_v55 = vpop.xlane.xlu2 %249  ;;  %v303_v62 = vmul.f32 %v984_v58, %v979_v50  ;;  %v296_v27 = vsel %vm295_vm8, %v748_v52, %v292_v14  ;;  %vm308_vm10 = vweird.f32 %v984_v58 }
 0x29c   :  { %751 = vrcp.f32 %v982_v55  ;;  %v301_v33 = vsel %vm298_vm9, %v300_v29, %v296_v27  ;;  %vm309_vm13 = vmor %vm307_vm11, %vm308_vm10  ;;  %v327_v59 = vand.u32 2147483648, %v982_v55  ;;  %vm321_vm5 = vweird.f32 %v982_v55 }
 0x29d   :  { %v304_v13 = vsub.f32 1.0, %v303_v62  ;;  %v374_v42 = vmul.f32 %v948_v16, %v301_v33  ;;  %v325_v61 = vand.u32 2147483647, %v982_v55 }
 0x29f   :  { %v305_v25 = vmul.f32 %v984_v58, %v304_v13  ;;  %vm326_vm7 = vcmp.eq.f32.partialorder %v325_v61, 8.507059e+37 }
 0x2a1   :  { %v306_v35 = vadd.f32 %v984_v58, %v305_v25 }
 0x2a2   :  { %v991_v17 = vpop.eup %751 }
 0x2a3   :  { %v726_v1 = vpop.permute.xlu1 %725  ;;  %v989_v2 = vpop.xlane.xlu2 %252  ;;  %v317_v26 = vmul.f32 %v991_v17, %v982_v55  ;;  %v310_v10 = vsel %vm309_vm13, %v984_v58, %v306_v35  ;;  %vm322_vm4 = vweird.f32 %v991_v17 }
 0x2a4   :  { %v727_v3 = vunpack.i.l.bf16 %v726_v1  ;;  %v238_v8 = vpop.xlane.xlu0 %237  ;;  %v728_v19 = vunpack.i.h.bf16 %v726_v1  ;;  %v315_v51 = vsel %vm312_vm2, %v314_v11, %v310_v10  ;;  %vm323_vm6 = vmor %vm321_vm5, %vm322_vm4  ;;  %v328_v1 = vor.u32 1.1754944e-38, %v327_v59 }
 0x2a5   :  { %753 = vrcp.f32 %v238_v8  ;;  %v318_v34 = vsub.f32 1.0, %v317_v26  ;;  %v271_v41 = vand.u32 2147483648, %v238_v8  ;;  %v269_v46 = vand.u32 2147483647, %v238_v8 }
 0x2a6   :  { %424 = vmatpush.msra.mxu0 %v727_v3  ;;  %716 = vmatpush.msra.mxu2 %v727_v3  ;;  %755 = vrcp.f32 %v989_v2  ;;  %vm265_vm14 = vweird.f32 %v238_v8  ;;  %v375_v60 = vmul.f32 %v952_v22, %v315_v51  ;;  %vm335_vm9 = vweird.f32 %v989_v2 }
 0x2a7   :  { %v319_v48 = vmul.f32 %v991_v17, %v318_v34  ;;  %v272_v16 = vor.u32 1.1754944e-38, %v271_v41  ;;  %vm270_vm3 = vcmp.eq.f32.partialorder %v269_v46, 8.507059e+37  ;;  %v339_v13 = vand.u32 2147483647, %v989_v2 }
 0x2a8   :  { %425 = vmatpush.msra.mxu0 %v728_v19  ;;  %717 = vmatpush.msra.mxu2 %v728_v19 }
 0x2a9   :  { %703 = vmatmul.msk.f32.vlgmr.msra.gmra.mxu2 %vm187_vm1, %v373_v21  ;;  %v320_v56 = vadd.f32 %v991_v17, %v319_v48  ;;  %vm340_vm11 = vcmp.eq.f32.partialorder %v339_v13, 8.507059e+37 }
 0x2ab   :  { %v754_v30 = vpop.eup %753  ;;  %v999_v32 = vpop.xlane.xlu2 %255  ;;  %v324_v0 = vsel %vm323_vm6, %v991_v17, %v320_v56 }
 0x2ac   :  { %v261_v6 = vmul.f32 %v754_v30, %v238_v8  ;;  %v1003_v36 = vpop.eup %755  ;;  %vm266_vm12 = vweird.f32 %v754_v30  ;;  %757 = vrcp.f32 %v999_v32  ;;  %v341_v8 = vand.u32 2147483648, %v989_v2 }
 0x2ad   :  { %v331_v49 = vmul.f32 %v1003_v36, %v989_v2  ;;  %vm267_vm15 = vmor %vm265_vm14, %vm266_vm12  ;;  %vm336_vm8 = vweird.f32 %v1003_v36  ;;  %v355_v26 = vand.u32 2147483648, %v999_v32  ;;  %vm349_vm13 = vweird.f32 %v999_v32 }
 0x2ae   :  { %v262_v40 = vsub.f32 1.0, %v261_v6  ;;  %vm337_vm10 = vmor %vm335_vm9, %vm336_vm8  ;;  %v342_v19 = vor.u32 1.1754944e-38, %v341_v8  ;;  %v353_v2 = vand.u32 2147483647, %v999_v32 }
 0x2af   :  { %v332_v53 = vsub.f32 1.0, %v331_v49 }
 0x2b0   :  { %v263_v45 = vmul.f32 %v754_v30, %v262_v40 }
 0x2b1   :  { %704 = vmatmul.msk.f32.gmra.mxu2 %vm187_vm1, %v374_v42  ;;  %v333_v62 = vmul.f32 %v1003_v36, %v332_v53  ;;  %v34_v42 = vld [vmem:[%s1175_s2 + $0x18] sm:$0xff] }
 0x2b2   :  { %v264_v12 = vadd.f32 %v754_v30, %v263_v45  ;;  %v758_v57 = vpop.eup %757  ;;  %492 = vmatpush.msra.mxu3 %v34_v42  ;;  %v32_v45 = vld [vmem:[%s1175_s2 + $0x8] sm:$0xff] }
 0x2b3   :  { %v259_v54 = vpop.xlane.xlu2 %258  ;;  %v345_v63 = vmul.f32 %v758_v57, %v999_v32  ;;  %v334_v22 = vadd.f32 %v1003_v36, %v333_v62  ;;  %vm350_vm12 = vweird.f32 %v758_v57 }
 0x2b4   :  { %v268_v50 = vsel %vm267_vm15, %v754_v30, %v264_v12  ;;  %759 = vrcp.f32 %v259_v54  ;;  %vm351_vm14 = vmor %vm349_vm13, %vm350_vm12  ;;  %v356_v30 = vor.u32 1.1754944e-38, %v355_v26  ;;  %vm354_vm15 = vcmp.eq.f32.partialorder %v353_v2, 8.507059e+37 }
 0x2b5   :  { %v273_v52 = vsel %vm270_vm3, %v272_v16, %v268_v50  ;;  %v346_v3 = vsub.f32 1.0, %v345_v63  ;;  %v338_v18 = vsel %vm337_vm10, %v1003_v36, %v334_v22  ;;  %v369_v34 = vand.u32 2147483648, %v259_v54 }
 0x2b6   :  { %v372_v58 = vmul.f32 %v962_v39, %v273_v52  ;;  %v329_v39 = vsel %vm326_vm7, %v328_v1, %v324_v0  ;;  %v343_v21 = vsel %vm340_vm11, %v342_v19, %v338_v18  ;;  %vm363_vm3 = vweird.f32 %v259_v54 }
 0x2b7   :  { %v376_v9 = vmul.f32 %v956_v31, %v329_v39  ;;  %v347_v14 = vmul.f32 %v758_v57, %v346_v3  ;;  %v377_v31 = vmul.f32 %v960_v37, %v343_v21  ;;  %v367_v36 = vand.u32 2147483647, %v259_v54 }
 0x2b8   :  { %702 = vmatmul.msk.f32.vlgmr.msra.gmra.mxu0 %vm187_vm1, %v372_v58  ;;  %v370_v32 = vor.u32 1.1754944e-38, %v369_v34  ;;  %v799_v21 = vmov 32.0  }
 0x2b9   :  { %705 = vmatmul.msk.f32.gmra.mxu2 %vm187_vm1, %v375_v60  ;;  %v348_v25 = vadd.f32 %v758_v57, %v347_v14  ;;  %vm368_vm5 = vcmp.eq.f32.partialorder %v367_v36, 8.507059e+37  ;;  %761 = vrcp.f32 %v799_v21  ;;  %v36_v21 = vld [vmem:[%s1175_s2 + $0x28] sm:$0xff] }
 0x2ba   :  { %v760_v55 = vpop.eup %759 }
 0x2bb   :  { %v359_v17 = vmul.f32 %v760_v55, %v259_v54  ;;  %v352_v29 = vsel %vm351_vm14, %v758_v57, %v348_v25  ;;  %vm364_vm2 = vweird.f32 %v760_v55 }
 0x2bc   :  { %v357_v6 = vsel %vm354_vm15, %v356_v30, %v352_v29  ;;  %vm365_vm4 = vmor %vm363_vm3, %vm364_vm2 }
 0x2bd   :  { %v360_v23 = vsub.f32 1.0, %v359_v17  ;;  %v378_v35 = vmul.f32 %v971_v44, %v357_v6  ;;  %v33_v44 = vld [vmem:[%s1175_s2 + $0x10] sm:$0xff] }
 0x2be   :  { %493 = vmatpush.msra.mxu3 %v33_v44 }
 0x2bf   :  { %v361_v27 = vmul.f32 %v760_v55, %v360_v23  ;;  %v762_v23 = vpop.eup %761 }
 0x2c0   :  { %494 = vmatpush.msra.mxu3 %v32_v45  ;;  %v512_v25 = vmul.f32 32.0, %v762_v23  ;;  %v50_v45 = vld [vmem:[%s1175_s2 + $0x98] sm:$0xff] }
 0x2c1   :  { %706 = vmatmul.msk.f32.gmra.mxu2 %vm187_vm1, %v376_v9  ;;  %v362_v33 = vadd.f32 %v760_v55, %v361_v27 }
 0x2c2   :  { %v513_v26 = vsub.f32 1.0, %v512_v25  ;;  %v562_v25 = vperm.slane %v862_v7, 2 }
 0x2c3   :  { %v366_v37 = vsel %vm365_vm4, %v760_v55, %v362_v33 }
 0x2c4   :  { %v371_v38 = vsel %vm368_vm5, %v370_v32, %v366_v37  ;;  %v30_v32 = vld [vmem:[%s1174_s1 + $0x38] sm:$0xff] }
 0x2c5   :  { %v379_v40 = vmul.f32 %v975_v47, %v371_v38  ;;  %v31_v47 = vld [vmem:[%s1175_s2] sm:$0xff]  ;;  %581 = vmatpush.msrb.mxu0 %v30_v32  ;;  %v29_v38 = vld [vmem:[%s1174_s1 + $0x30] sm:$0xff] }
 0x2c6   :  { %495 = vmatpush.msra.mxu3 %v31_v47  ;;  %v49_v47 = vld [vmem:[%s1175_s2 + $0x90] sm:$0xff] }
 0x2c7   :  { %582 = vmatpush.msrb.mxu0 %v29_v38 }
 0x2c8   :  { %595 = vmatpush.msrb.mxu3 %v50_v45 }
 0x2c9   :  { %707 = vmatmul.msk.f32.gmra.mxu2 %vm187_vm1, %v377_v31  ;;  %v514_v31 = vmul.f32 %v762_v23, %v513_v26 }
 0x2ca   :  { %596 = vmatpush.msrb.mxu3 %v49_v47 }
 0x2cb   :  { %v515_v2 = vadd.f32 %v762_v23, %v514_v31 }
 0x2d1   :  { %708 = vmatmul.msk.f32.gmra.mxu2 %vm187_vm1, %v378_v35 }
 0x2d9   :  { %709 = vmatmul.msk.f32.gmra.mxu2 %vm187_vm1, %v379_v40  ;;  %vm516_vm1 = vweird.f32 %v762_v23  ;;  %v28_v40 = vld [vmem:[%s1174_s1 + $0x28] sm:$0xff] }
 0x2da   :  { %v1079_v27 = vsel %vm516_vm1, %v762_v23, %v515_v2  ;;  %583 = vmatpush.msrb.mxu0 %v28_v40  ;;  %v35_v23 = vld [vmem:[%s1175_s2 + $0x20] sm:$0xff] }
 0x32c   :  { %v430_v41 = vpop.f32.mrf.mxu2 }
 0x32d   :  { %v452_v58 = vmul.f32 %v430_v41, %v878_v15  ;;  %v27_v41 = vld [vmem:[%s1174_s1 + $0x20] sm:$0xff]  ;;  %s678_s1 = sshll.u32 %s1178_s5, 4  ;;  %s679_s1 = int_to_ptr.hbm [resolvable:$true] %s678_s1 }
 0x32e   :  { %584 = vmatpush.msrb.mxu0 %v27_v41 }
 0x32f   :  { %v466_v0 = vsel %vm58_vm0, %v452_v58, 0.0  ;;  %v42_v58 = vld [vmem:[%s1175_s2 + $0x58] sm:$0xff] }
 0x334   :  { %v433_v43 = vpop.f32.mrf.mxu2 }
 0x335   :  { %v427_v49 = vpop.f32.mrf.mxu0  ;;  %v453_v12 = vmul.f32 %v433_v43, %v888_v20 }
 0x336   :  { %v451_v11 = vmul.f32 %v427_v49, %v878_v15 }
 0x337   :  { %v460_v51 = vsel %vm58_vm0, %v453_v12, 0.0 }
 0x338   :  { %v459_v50 = vsel %vm58_vm0, %v451_v11, 0.0 }
 0x339   :  { %v461_v53 = vadd.f32 %v460_v51, %v459_v50  ;;  %v45_v51 = vld [vmem:[%s1175_s2 + $0x70] sm:$0xff] }
 0x33c   :  { %v436_v46 = vpop.f32.mrf.mxu2 }
 0x33d   :  { %v454_v56 = vmul.f32 %v436_v46, %v888_v20  ;;  %v48_v46 = vld [vmem:[%s1175_s2 + $0x88] sm:$0xff] }
 0x33e   :  { %597 = vmatpush.msrb.mxu3 %v48_v46 }
 0x33f   :  { %v467_v63 = vsel %vm58_vm0, %v454_v56, 0.0  ;;  %v43_v56 = vld [vmem:[%s1175_s2 + $0x60] sm:$0xff] }
 0x340   :  { %v468_v39 = vadd.f32 %v467_v63, %v466_v0  ;;  %v41_v63 = vld [vmem:[%s1175_s2 + $0x50] sm:$0xff] }
 0x344   :  { %v439_v48 = vpop.f32.mrf.mxu2 }
 0x345   :  { %v455_v16 = vmul.f32 %v439_v48, %v896_v24 }
 0x347   :  { %v462_v52 = vsel %vm58_vm0, %v455_v16, 0.0  ;;  %v46_v16 = vld [vmem:[%s1175_s2 + $0x78] sm:$0xff] }
 0x348   :  { %v463_v59 = vadd.f32 %v462_v52, %v461_v53  ;;  %v44_v53 = vld [vmem:[%s1175_s2 + $0x68] sm:$0xff] }
 0x34c   :  { %v442_v10 = vpop.f32.mrf.mxu2 }
 0x34d   :  { %v456_v60 = vmul.f32 %v442_v10, %v896_v24  ;;  %v473_v24 = vperm.slane %v862_v7, 1  ;;  %v47_v10 = vld [vmem:[%s1175_s2 + $0x80] sm:$0xff] }
 0x34e   :  { %598 = vmatpush.msrb.mxu3 %v47_v10 }
 0x34f   :  { %v469_v1 = vsel %vm58_vm0, %v456_v60, 0.0 }
 0x350   :  { %v470_v22 = vadd.f32 %v469_v1, %v468_v39  ;;  %599 = vmatpush.msrb.mxu3 %v46_v16 }
 0x352   :  { %600 = vmatpush.msrb.mxu3 %v45_v51 }
 0x354   :  { %v445_v54 = vpop.f32.mrf.mxu2  ;;  %601 = vmatpush.msrb.mxu3 %v44_v53 }
 0x355   :  { %v457_v57 = vmul.f32 %v445_v54, %v904_v28 }
 0x356   :  { %602 = vmatpush.msrb.mxu3 %v43_v56 }
 0x357   :  { %v464_v61 = vsel %vm58_vm0, %v457_v57, 0.0 }
 0x358   :  { %v465_v62 = vadd.f32 %v464_v61, %v463_v59  ;;  %603 = vmatpush.msrb.mxu3 %v42_v58 }
 0x35a   :  { %710 = vmatmul.msk.f32.vlgmr.msra.gmra.mxu3 %vm58_vm0, %v465_v62  ;;  %v556_v62 = vperm.slane %v862_v7, 4 }
 0x35b   :  { %604 = vmatpush.msrb.mxu3 %v41_v63 }
 0x35c   :  { %v448_v20 = vpop.f32.mrf.mxu2 }
 0x35d   :  { %v458_v3 = vmul.f32 %v448_v20, %v904_v28  ;;  %v559_v20 = vperm.slane %v862_v7, 5 }
 0x35f   :  { %v471_v15 = vsel %vm58_vm0, %v458_v3, 0.0  ;;  %v40_v3 = vld [vmem:[%s1175_s2 + $0x48] sm:$0xff] }
 0x360   :  { %v472_v55 = vadd.f32 %v471_v15, %v470_v22  ;;  %605 = vmatpush.msrb.mxu3 %v40_v3 }
 0x362   :  { %711 = vmatmul.msk.f32.gmra.mxu3 %vm58_vm0, %v472_v55  ;;  %v39_v55 = vld [vmem:[%s1175_s2 + $0x40] sm:$0xff] }
 0x363   :  { %606 = vmatpush.msrb.mxu3 %v39_v55 }
 0x3dd   :  { %v497_v8 = vpop.f32.mrf.mxu3 }
 0x3de   :  { %v498_v9 = vadd.f32 %v497_v8, %v473_v24 }
 0x3e0   :  { %v503_v13 = vadd.f32 %v498_v9, %v848_v4  ;;  %v38_v9 = vld [vmem:[%s1175_s2 + $0x38] sm:$0xff] }
 0x3e1   :  { %607 = vmatpush.msrb.mxu3 %v38_v9 }
 0x3e2   :  { %v505_v14 = vsel %vm58_vm0, %v503_v13, 0.0 }
 0x3e3   :  { %506 = vadd.xlane.f32.xlu1 %v505_v14 }
 0x3e5   :  { %v500_v17 = vpop.f32.mrf.mxu3 }
 0x3e6   :  { %v501_v18 = vadd.f32 %v500_v17, %v473_v24 }
 0x3e8   :  { %v504_v19 = vadd.f32 %v501_v18, %v855_v5 }
 0x3ea   :  { %v508_v28 = vsel %vm58_vm0, %v504_v19, 0.0 }
 0x3eb   :  { %509 = vadd.xlane.f32.xlu0 %v508_v28  ;;  %v37_v28 = vld [vmem:[%s1175_s2 + $0x30] sm:$0xff]  ;;  %s800_s2 = smov [#allocation2]  }
 0x3ec   :  { %608 = vmatpush.msrb.mxu3 %v37_v28  ;;  %s676_s16 = sshll.u32 %s800_s2, 4  ;;  %s677_s16 = int_to_ptr.vmem [resolvable:$true] %s676_s16 }
 0x3ee   :  { %609 = vmatpush.msrb.mxu3 %v36_v21 }
 0x3f0   :  { %610 = vmatpush.msrb.mxu3 %v35_v23 }
 0x456   :  { %v507_v4 = vpop.xlane.xlu1 %506 }
 0x457   :  { %v518_v29 = vmul.f32 %v1079_v27, %v507_v4 }
 0x459   :  { %v520_v30 = vsub.f32 %v503_v13, %v518_v29 }
 0x45b   :  { %v522_v6 = vmul.f32 %v520_v30, %v520_v30 }
 0x45d   :  { %v524_v5 = vsel %vm58_vm0, %v522_v6, 0.0  ;;  %v594_v6 = vperm.slane %v862_v7, 3 }
 0x45e   :  { %525 = vadd.xlane.f32.xlu2 %v524_v5  ;;  %v510_v33 = vpop.xlane.xlu0 %509 }
 0x45f   :  { %v519_v34 = vmul.f32 %v1079_v27, %v510_v33 }
 0x461   :  { %v1084_v35 = vsub.f32 %v504_v19, %v519_v34 }
 0x463   :  { %v523_v36 = vmul.f32 %v1084_v35, %v1084_v35 }
 0x465   :  { %v527_v37 = vsel %vm58_vm0, %v523_v36, 0.0 }
 0x466   :  { %528 = vadd.xlane.f32.xlu0 %v527_v37 }
 0x4d1   :  { %v526_v42 = vpop.xlane.xlu2 %525 }
 0x4d2   :  { %v530_v43 = vmul.f32 %v526_v42, %v1079_v27 }
 0x4d4   :  { %v532_v44 = vadd.f32 1e-05, %v530_v43 }
 0x4d6   :  { %763 = vrsqrt.f32 %v532_v44  ;;  %vm540_vm7 = vweird.f32 %v532_v44 }
 0x4d9   :  { %v529_v48 = vpop.xlane.xlu0 %528 }
 0x4da   :  { %v531_v49 = vmul.f32 %v529_v48, %v1079_v27 }
 0x4dc   :  { %v764_v11 = vpop.eup %763  ;;  %v533_v12 = vadd.f32 1e-05, %v531_v49 }
 0x4dd   :  { %v535_v50 = vmul.f32 %v764_v11, %v532_v44  ;;  %vm541_vm6 = vweird.f32 %v764_v11 }
 0x4de   :  { %765 = vrsqrt.f32 %v533_v12  ;;  %vm542_vm8 = vmor %vm540_vm7, %vm541_vm6  ;;  %vm550_vm10 = vweird.f32 %v533_v12 }
 0x4df   :  { %v536_v52 = vmul.f32 %v764_v11, %v535_v50 }
 0x4e1   :  { %v537_v54 = vmul.f32 0.5, %v536_v52 }
 0x4e3   :  { %v538_v57 = vsub.f32 1.5, %v537_v54 }
 0x4e4   :  { %v766_v59 = vpop.eup %765 }
 0x4e5   :  { %v539_v60 = vmul.f32 %v764_v11, %v538_v57  ;;  %v545_v61 = vmul.f32 %v766_v59, %v533_v12  ;;  %vm551_vm9 = vweird.f32 %v766_v59 }
 0x4e6   :  { %vm552_vm11 = vmor %vm550_vm10, %vm551_vm9 }
 0x4e7   :  { %v543_v0 = vsel %vm542_vm8, %v764_v11, %v539_v60  ;;  %v546_v1 = vmul.f32 %v766_v59, %v545_v61  ;;  %v664_v61 = vperm.slane %v862_v7, 6 }
 0x4e8   :  { %v554_v39 = vmul.f32 %v543_v0, %v520_v30 }
 0x4e9   :  { %v547_v22 = vmul.f32 0.5, %v546_v1 }
 0x4ea   :  { %v557_v15 = vmul.f32 %v556_v62, %v554_v39 }
 0x4eb   :  { %v548_v24 = vsub.f32 1.5, %v547_v22 }
 0x4ec   :  { %v560_v8 = vadd.f32 %v559_v20, %v557_v15 }
 0x4ed   :  { %v549_v13 = vmul.f32 %v766_v59, %v548_v24 }
 0x4ee   :  { %712 = vmatmul.msk.f32.vlgmr.msrb.gmra.mxu0 %vm58_vm0, %v560_v8 }
 0x4ef   :  { %v553_v14 = vsel %vm552_vm11, %v766_v59, %v549_v13 }
 0x4f0   :  { %v555_v17 = vmul.f32 %v553_v14, %v1084_v35 }
 0x4f2   :  { %v558_v18 = vmul.f32 %v556_v62, %v555_v17 }
 0x4f4   :  { %v561_v19 = vadd.f32 %v559_v20, %v558_v18 }
 0x4f6   :  { %713 = vmatmul.msk.f32.gmra.mxu0 %vm58_vm0, %v561_v19 }
 0x56b   :  { %v586_v26 = vpop.f32.mrf.mxu0 }
 0x56c   :  { %v587_v31 = vadd.f32 %v586_v26, %v562_v25 }
 0x56e   :  { %v592_v2 = vmax.f32 %v587_v31, 0.0 }
 0x570   :  { %611 = vmatmul.f32.vlgmr.msrb.gmra.mxu3 %v592_v2 }
 0x573   :  { %v589_v4 = vpop.f32.mrf.mxu0 }
 0x574   :  { %v590_v29 = vadd.f32 %v589_v4, %v562_v25 }
 0x576   :  { %v593_v30 = vmax.f32 %v590_v29, 0.0 }
 0x578   :  { %614 = vmatmul.f32.gmra.mxu3 %v593_v30 }
 0x5f3   :  { %v612_v5 = vpop.f32.mrf.mxu3 }
 0x5f4   :  { %v613_v33 = vadd.f32 %v612_v5, %v594_v6 }
 0x5f6   :  { %v618_v34 = vadd.f32 %v613_v33, %v560_v8 }
 0x5f8   :  { %v620_v35 = vsel %vm58_vm0, %v618_v34, 0.0 }
 0x5f9   :  { %621 = vadd.xlane.f32.xlu2 %v620_v35 }
 0x5fb   :  { %v615_v36 = vpop.f32.mrf.mxu3 }
 0x5fc   :  { %v616_v37 = vadd.f32 %v615_v36, %v594_v6 }
 0x5fe   :  { %v619_v32 = vadd.f32 %v616_v37, %v561_v19 }
 0x600   :  { %v623_v38 = vsel %vm58_vm0, %v619_v32, 0.0 }
 0x601   :  { %624 = vadd.xlane.f32.xlu0 %v623_v38 }
 0x66c   :  { %v622_v40 = vpop.xlane.xlu2 %621 }
 0x66d   :  { %v626_v41 = vmul.f32 %v622_v40, %v1079_v27 }
 0x66f   :  { %v628_v42 = vsub.f32 %v618_v34, %v626_v41 }
 0x671   :  { %v630_v43 = vmul.f32 %v628_v42, %v628_v42 }
 0x673   :  { %v632_v44 = vsel %vm58_vm0, %v630_v43, 0.0 }
 0x674   :  { %v625_v45 = vpop.xlane.xlu0 %624  ;;  %633 = vadd.xlane.f32.xlu2 %v632_v44 }
 0x675   :  { %v627_v47 = vmul.f32 %v625_v45, %v1079_v27 }
 0x677   :  { %v629_v46 = vsub.f32 %v619_v32, %v627_v47 }
 0x679   :  { %v631_v48 = vmul.f32 %v629_v46, %v629_v46 }
 0x67b   :  { %v635_v49 = vsel %vm58_vm0, %v631_v48, 0.0 }
 0x67c   :  { %636 = vadd.xlane.f32.xlu0 %v635_v49 }
 0x6e7   :  { %v634_v10 = vpop.xlane.xlu2 %633 }
 0x6e8   :  { %v638_v11 = vmul.f32 %v634_v10, %v1079_v27 }
 0x6ea   :  { %v640_v12 = vadd.f32 1e-05, %v638_v11 }
 0x6ec   :  { %767 = vrsqrt.f32 %v640_v12  ;;  %vm648_vm13 = vweird.f32 %v640_v12 }
 0x6ef   :  { %v637_v16 = vpop.xlane.xlu0 %636 }
 0x6f0   :  { %v639_v50 = vmul.f32 %v637_v16, %v1079_v27  ;;  %v667_v27 = vperm.slane %v862_v7, 7 }
 0x6f2   :  { %v768_v51 = vpop.eup %767  ;;  %v641_v52 = vadd.f32 1e-05, %v639_v50 }
 0x6f3   :  { %v643_v53 = vmul.f32 %v768_v51, %v640_v12  ;;  %vm649_vm12 = vweird.f32 %v768_v51 }
 0x6f4   :  { %769 = vrsqrt.f32 %v641_v52  ;;  %vm650_vm14 = vmor %vm648_vm13, %vm649_vm12  ;;  %vm658_vm2 = vweird.f32 %v641_v52 }
 0x6f5   :  { %v644_v54 = vmul.f32 %v768_v51, %v643_v53 }
 0x6f7   :  { %v645_v56 = vmul.f32 0.5, %v644_v54 }
 0x6f9   :  { %v646_v57 = vsub.f32 1.5, %v645_v56 }
 0x6fa   :  { %v770_v59 = vpop.eup %769 }
 0x6fb   :  { %v647_v58 = vmul.f32 %v768_v51, %v646_v57  ;;  %v653_v60 = vmul.f32 %v770_v59, %v641_v52  ;;  %vm659_vm15 = vweird.f32 %v770_v59 }
 0x6fc   :  { %vm660_vm3 = vmor %vm658_vm2, %vm659_vm15 }
 0x6fd   :  { %v651_v62 = vsel %vm650_vm14, %v768_v51, %v647_v58  ;;  %v654_v63 = vmul.f32 %v770_v59, %v653_v60 }
 0x6fe   :  { %v662_v0 = vmul.f32 %v651_v62, %v628_v42 }
 0x6ff   :  { %v655_v1 = vmul.f32 0.5, %v654_v63 }
 0x700   :  { %v665_v39 = vmul.f32 %v664_v61, %v662_v0 }
 0x701   :  { %v656_v20 = vsub.f32 1.5, %v655_v1 }
 0x702   :  { %v668_v3 = vadd.f32 %v667_v27, %v665_v39 }
 0x703   :  { %v657_v22 = vmul.f32 %v770_v59, %v656_v20 }
 0x704   :  { %670 = vst.msk [vmem:[#allocation2] sm:$0xff] %vm58_vm0, %v668_v3 }
 0x705   :  { %v661_v15 = vsel %vm660_vm3, %v770_v59, %v657_v22 }
 0x706   :  { %v663_v55 = vmul.f32 %v661_v15, %v629_v46 }
 0x708   :  { %v666_v24 = vmul.f32 %v664_v61, %v663_v55 }
 0x70a   :  { %v669_v7 = vadd.f32 %v667_v27, %v666_v24 }
 0x70c   :  { %671 = vst.msk [vmem:[#allocation2 + $0x8] sm:$0xff] %vm58_vm0, %v669_v7 }
 0x70d   :  { %684 = dma.vmem_to_hbm [thread:$0]  %s677_s16, 256, %s679_s1, [#allocation3], %s801_s19, %s801_s19, %s802_s20  }
 0x70e   :  { %795 = dma.done.wait [#allocation3], 256  }
 0x70f   :  { %796 = vsyncadd [#allocation3], 4294967040 }
 0x710   :  { %689 = vsyncpa [#allocation3], 1 }

</bundles_post_ra>
